<compile_context>
chip_gen: v7x
topology: tpu7x:2x2x1
jax: 0.10.0
libtpu: 0.0.40
codegen_flags: <defaults>
</compile_context>

<pallas_src>
import jax
import jax.numpy as jnp
from jax.experimental import pallas as pl
from jax.experimental.pallas import tpu as pltpu

_MAX_TILE = 32768  # lanes per grid step for very large batches (multiple of 128)


def _motion_kernel(scal_ref, data_ref, out_ref):
    # Scalar parameters, precomputed on the host scalar path, read from SMEM.
    neg_wheel_base = scal_ref[0]     # -wheelBase
    drive_scale = scal_ref[1]        # driveScale
    half_wb = scal_ref[2]            # wheelBase / 2
    neg_ratio = scal_ref[3]          # -driveScale / wheelBase

    # Batch is the lane axis: row 0 = throttle, row 1 = steering (lane-dense).
    throttle = data_ref[0:1, :]      # (1, T)
    steering = data_ref[1:2, :]      # (1, T)

    sin_s = jnp.sin(steering)
    cos_s = jnp.cos(steering)
    inv_sin = pl.reciprocal(sin_s, approx=True)   # EUP vrcp; inf on steering==0 rows
    inv_cos = pl.reciprocal(cos_s, approx=True)

    # turnRadius = -wheelBase / tan(steering) = -wheelBase * cos(s) / sin(s)
    turn_radius = neg_wheel_base * cos_s * inv_sin
    driving_distance = drive_scale * throttle
    # heading = drivingDistance / turnRadius = -(driveScale/wheelBase)*throttle*tan(s)
    # (exactly +/-0.0 on steering==0 rows, so the sin/cos below can be reused for
    #  the rear-axle correction without recomputing after the mask)
    heading_raw = neg_ratio * throttle * sin_s * inv_cos

    sin_h = jnp.sin(heading_raw)     # reused for arc terms AND axle correction
    cos_h = jnp.cos(heading_raw)

    x = turn_radius * sin_h          # NaN on steering==0 rows (inf * 0) -> masked below
    y = turn_radius * (1.0 - cos_h)

    straight = steering == 0.0       # torch: `steering == 0` masked assignments
    heading = jnp.where(straight, 0.0, heading_raw)
    x = jnp.where(straight, driving_distance, x)
    y = jnp.where(straight, 0.0, y)

    x = x + half_wb * cos_h - half_wb
    y = y + half_wb * sin_h

    # Three full-lane row stores; no iota/select relayout.
    out_ref[0:1, :] = x
    out_ref[1:2, :] = y
    out_ref[2:3, :] = heading


@jax.jit
def simple_motion_model(wheel_base, drive_scale, controls):
    """Forward pass. `controls` = torch data[0]: (B, 2) = [throttle, steering]; returns (B, 3)."""
    controls = controls.astype(jnp.float32)
    B = controls.shape[0]
    controls_t = controls.T                                  # (2, B): batch -> lanes

    wb = jnp.asarray(wheel_base, jnp.float32)
    ds = jnp.asarray(drive_scale, jnp.float32)
    scalars = jnp.stack([-wb, ds, 0.5 * wb, -ds / wb])       # (4,) f32 -> SMEM

    tile = B if B <= _MAX_TILE else _MAX_TILE                # full array, or 128-mult tiles
    grid = (pl.cdiv(B, tile),)

    out_t = pl.pallas_call(
        _motion_kernel,
        out_shape=jax.ShapeDtypeStruct((3, B), jnp.float32),
        grid=grid,
        in_specs=[
            pl.BlockSpec(memory_space=pltpu.MemorySpace.SMEM),    # scalars (4,)
            pl.BlockSpec((2, tile), lambda i: (0, i)),            # controls (2, B)
        ],
        out_specs=pl.BlockSpec((3, tile), lambda i: (0, i)),      # (3, B)
        compiler_params=pltpu.CompilerParams(
            dimension_semantics=("parallel",)),                   # shards across v7x's 2 TCs
    )(scalars, controls_t)
    return out_t.T                                           # (B, 3), matching torch


# ---------------------------------------------------------------------------
# Pure-JAX (XLA) reference, faithful to the torch module, for a sanity check.
# ---------------------------------------------------------------------------
def reference(wheel_base, drive_scale, controls):
    throttle = controls[:, 0]
    steering = controls[:, 1]
    turn_radius = -wheel_base / jnp.tan(steering)
    driving_distance = drive_scale * throttle
    heading = driving_distance / turn_radius
    x = turn_radius * jnp.sin(heading)
    y = turn_radius * (1.0 - jnp.cos(heading))
    straight = steering == 0.0
    heading = jnp.where(straight, 0.0, heading)
    x = jnp.where(straight, driving_distance, x)
    y = jnp.where(straight, 0.0, y)
    x = x + wheel_base / 2.0 * jnp.cos(heading) - wheel_base / 2.0
    y = y + wheel_base / 2.0 * jnp.sin(heading)
    return jnp.stack([x, y, heading], axis=1)


if __name__ == "__main__":
    B = 256
    key = jax.random.PRNGKey(0)
    k1, k2 = jax.random.split(key)
    throttle = jax.random.normal(k1, (B,), jnp.float32)
    steering = 0.4 * jax.random.normal(k2, (B,), jnp.float32)   # plausible steering angles
    controls = jnp.stack([throttle, steering], axis=1)          # (B, 2)
    # Exercise the `steering == 0` (straight-line) masked branch on a couple of rows.
    controls = controls.at[3, 1].set(0.0)
    controls = controls.at[100, 1].set(0.0)

    wheel_base = jnp.float32(0.9)      # module's initial wheelBase parameter
    drive_scale = jnp.float32(0.0096)  # module's initial driveScale parameter

    out = simple_motion_model(wheel_base, drive_scale, controls)
    jax.block_until_ready(out)

    want = reference(wheel_base, drive_scale, controls)
    assert out.shape == (B, 3), out.shape
    assert bool(jnp.all(jnp.isfinite(out))), "non-finite values in kernel output"
    # approx EUP reciprocals carry ~2^-12..2^-14 relative error vs. the exact-divide
    # reference; outputs here are O(1e-2..1e0), so this tolerance is comfortable.
    assert jnp.allclose(out, want, atol=1e-4, rtol=1e-3), (
        f"mismatch: max abs diff {float(jnp.max(jnp.abs(out - want)))}")

    print("KERNEL_OK")
</pallas_src>

<mosaic_0001>
module attributes {stable_mosaic.version = 11 : i64} {
  func.func @_motion_kernel(%arg0: i32, %arg1: memref<4xf32, #tpu.memory_space<smem>>, %arg2: memref<2x256xf32, #tpu.memory_space<vmem>>, %arg3: memref<3x256xf32, #tpu.memory_space<vmem>>) attributes {dimension_semantics = [#tpu.dimension_semantics<parallel>], iteration_bounds = array<i64: 1>, scalar_prefetch = 0 : i64, scratch_operands = 0 : i64, tpu.core_type = #tpu.core_type<tc>, window_params = [{transform_indices = @transform_0, window_bounds = array<i64: 4>}, {transform_indices = @transform_1, window_bounds = array<i64: 2, 256>}, {transform_indices = @transform_2, window_bounds = array<i64: 3, 256>}]} {
    %c0 = arith.constant 0 : index
    %0 = memref.load %arg1[%c0] : memref<4xf32, #tpu.memory_space<smem>>
    %c1 = arith.constant 1 : index
    %1 = memref.load %arg1[%c1] : memref<4xf32, #tpu.memory_space<smem>>
    %c2 = arith.constant 2 : index
    %2 = memref.load %arg1[%c2] : memref<4xf32, #tpu.memory_space<smem>>
    %c3 = arith.constant 3 : index
    %3 = memref.load %arg1[%c3] : memref<4xf32, #tpu.memory_space<smem>>
    %c0_0 = arith.constant 0 : index
    %c0_1 = arith.constant 0 : index
    %4 = vector.load %arg2[%c0_0, %c0_1] : memref<2x256xf32, #tpu.memory_space<vmem>>, vector<1x256xf32>
    %c1_2 = arith.constant 1 : index
    %c0_3 = arith.constant 0 : index
    %5 = vector.load %arg2[%c1_2, %c0_3] : memref<2x256xf32, #tpu.memory_space<vmem>>, vector<1x256xf32>
    %6 = math.sin %5 : vector<1x256xf32>
    %7 = math.cos %5 : vector<1x256xf32>
    %8 = tpu.reciprocal %6 {approx = true} : vector<1x256xf32> -> vector<1x256xf32>
    %9 = tpu.reciprocal %7 {approx = true} : vector<1x256xf32> -> vector<1x256xf32>
    %10 = vector.broadcast %0 : f32 to vector<1x256xf32>
    %11 = arith.mulf %10, %7 : vector<1x256xf32>
    %12 = arith.mulf %11, %8 : vector<1x256xf32>
    %13 = vector.broadcast %1 : f32 to vector<1x256xf32>
    %14 = arith.mulf %13, %4 : vector<1x256xf32>
    %15 = vector.broadcast %3 : f32 to vector<1x256xf32>
    %16 = arith.mulf %15, %4 : vector<1x256xf32>
    %17 = arith.mulf %16, %6 : vector<1x256xf32>
    %18 = arith.mulf %17, %9 : vector<1x256xf32>
    %19 = math.sin %18 : vector<1x256xf32>
    %20 = math.cos %18 : vector<1x256xf32>
    %21 = arith.mulf %12, %19 : vector<1x256xf32>
    %cst = arith.constant 1.000000e+00 : f32
    %22 = vector.broadcast %cst : f32 to vector<1x256xf32>
    %23 = arith.subf %22, %20 : vector<1x256xf32>
    %24 = arith.mulf %12, %23 : vector<1x256xf32>
    %cst_4 = arith.constant 0.000000e+00 : f32
    %25 = vector.broadcast %cst_4 : f32 to vector<1x256xf32>
    %26 = arith.cmpf oeq, %5, %25 : vector<1x256xf32>
    %cst_5 = arith.constant 0.000000e+00 : f32
    %27 = vector.broadcast %cst_5 : f32 to vector<1x256xf32>
    %28 = arith.select %26, %27, %18 : vector<1x256xi1>, vector<1x256xf32>
    %29 = arith.select %26, %14, %21 : vector<1x256xi1>, vector<1x256xf32>
    %cst_6 = arith.constant 0.000000e+00 : f32
    %30 = vector.broadcast %cst_6 : f32 to vector<1x256xf32>
    %31 = arith.select %26, %30, %24 : vector<1x256xi1>, vector<1x256xf32>
    %32 = vector.broadcast %2 : f32 to vector<1x256xf32>
    %33 = arith.mulf %32, %20 : vector<1x256xf32>
    %34 = arith.addf %29, %33 : vector<1x256xf32>
    %35 = vector.broadcast %2 : f32 to vector<1x256xf32>
    %36 = arith.subf %34, %35 : vector<1x256xf32>
    %37 = vector.broadcast %2 : f32 to vector<1x256xf32>
    %38 = arith.mulf %37, %19 : vector<1x256xf32>
    %39 = arith.addf %31, %38 : vector<1x256xf32>
    %c0_7 = arith.constant 0 : index
    %c0_8 = arith.constant 0 : index
    %40 = vector.load %arg3[%c0_7, %c0_8] : memref<3x256xf32, #tpu.memory_space<vmem>>, vector<1x256xf32>
    tpu.vector_store %arg3[%c0_7, %c0_8], %36 {strides = array<i32>} : memref<3x256xf32, #tpu.memory_space<vmem>>, vector<1x256xf32>,
    %c1_9 = arith.constant 1 : index
    %c0_10 = arith.constant 0 : index
    %41 = vector.load %arg3[%c1_9, %c0_10] : memref<3x256xf32, #tpu.memory_space<vmem>>, vector<1x256xf32>
    tpu.vector_store %arg3[%c1_9, %c0_10], %39 {strides = array<i32>} : memref<3x256xf32, #tpu.memory_space<vmem>>, vector<1x256xf32>,
    %c2_11 = arith.constant 2 : index
    %c0_12 = arith.constant 0 : index
    %42 = vector.load %arg3[%c2_11, %c0_12] : memref<3x256xf32, #tpu.memory_space<vmem>>, vector<1x256xf32>
    tpu.vector_store %arg3[%c2_11, %c0_12], %28 {strides = array<i32>} : memref<3x256xf32, #tpu.memory_space<vmem>>, vector<1x256xf32>,
    return
  }
  func.func @transform_0(%arg0: i32) -> i32 {
    %c0_i32 = arith.constant 0 : i32
    %c0_i32_0 = arith.constant 0 : i32
    return %c0_i32 : i32
  }
  func.func @transform_1(%arg0: i32) -> (i32, i32) {
    %c0_i32 = arith.constant 0 : i32
    %c0_i32_0 = arith.constant 0 : i32
    return %c0_i32, %arg0 : i32, i32
  }
  func.func @transform_2(%arg0: i32) -> (i32, i32) {
    %c0_i32 = arith.constant 0 : i32
    %c0_i32_0 = arith.constant 0 : i32
    return %c0_i32, %arg0 : i32, i32
  }
}

</mosaic_0001>

<bundles_post_ra>
// kernel: simple_motion_model.1
= control target key start
LH: loop header
LB: loop body
LE: loop exit
PB: predicated region body
PF: predicated region fallthrough
CT: control target
= control target key end

     0   :  { %7 = vsyncpa [#allocation4], 0  ;;  %s714_s0 = inlined_call_operand.vmem [shape: f32[4], index: 0, kind: input, shape index: {}]   ;;  %s715_s1 = inlined_call_operand.vmem [shape: f32[2,256], index: 1, kind: input, shape index: {}]   ;;  %s716_s2 = inlined_call_operand.hbm [shape: f32[3,256], index: 2, kind: output, shape index: {}]  }
   0x1   :  { %8 = vsyncpa [#allocation3], 0  ;;  %s15_s11 = sshll.u32 %s714_s0, 4  ;;  %s16_s11 = int_to_ptr.vmem [resolvable:$true] %s15_s11 }
   0x2   :  { %s542_s12 = scalar_lea.vmem %s16_s11, 16  ;;  %p547_p1 = scmp.lt.s32.totalorder %s16_s11, %s16_s11 }
   0x3   :  { %p543_p0 = scmp.ne.s32.totalorder %s16_s11, %s542_s12  ;;  %p548_p2 = scmp.lt.s32.totalorder %s542_s12, %s542_s12 }
   0x5   :  { %p549_p3 = por %p548_p2, %p547_p1 }
   0x7   :  { %p550_p4 = pnand %p549_p3, %p543_p0 }
   0x9   :  { %553 = shalt.err (!%p550_p4)
}
   0xa   :  { %s580_s13 = smov [#allocation2]  }
   0xb   :  { %18 = dma.vmem_to_smem %s16_s11, 16, %s580_s13, [#allocation4]  }
   0xc   :  { %576 = dma.done.wait [#allocation4], 16  }
   0xd   :  { %577 = vsyncadd [#allocation4], 4294967280 }
   0xe   :  { %24 = sfence }
   0xf   :  { %v609_v0 = vld [vmem:[%s715_s1 + $0x1] ss:$2 sm:$0x3]  ;;  %v581_v12 = vmov 683565275   ;;  %s496_s0 = sld [smem:[#allocation2 + $0x3]] }
  0x10   :  { %v35_v1 = vand.u32 2139095040, %v609_v0  ;;  %v32_v3 = vand.u32 2147483647, %v609_v0  ;;  %v582_v14 = vmov 2475754826   ;;  %vm34_vm7 = vcmp.lt.s32.totalorder %v609_v0, 0 }
  0x11   :  { %v583_v16 = vmov 2131351028   ;;  %v584_v18 = vmov 2102212464   ;;  %v585_v20 = vmov 920167782   ;;  %vm124_vm15 = vweird.f32 %v609_v0 }
  0x12   :  { %v36_v2 = vshrl.u32 %v35_v1, 23  ;;  %v39_v6 = vand.u32 8388607, %v32_v3  ;;  %v586_v27 = vmov 1326507024   ;;  %s25_s16 = sld [smem:[#allocation2]] }
  0x13   :  { %vm33_vm8 = vcmp.le.f32.partialorder %v32_v3, 0.7853982  ;;  %s495_s19 = sld [smem:[#allocation2 + $0x2]]  ;;  %s587_s20 = smov [#allocation5]  }
  0x14   :  { %v498_v4 = vadd.s32 4294967169, %v36_v2  ;;  %v40_v9 = vor.u32 8388608, %v39_v6  ;;  %s485_s21 = sshll.u32 %s587_s20, 4  ;;  %s486_s21 = int_to_ptr.vmem [resolvable:$true] %s485_s21 }
  0x15   :  { %s554_s22 = scalar_lea.vmem %s486_s21, 128  ;;  %p559_p6 = scmp.lt.s32.totalorder %s486_s21, %s486_s21 }
  0x16   :  { %v42_v5 = vadd.s32 1, %v498_v4  ;;  %v80_v29 = vshll.u32 %v40_v9, 8  ;;  %p555_p5 = scmp.ne.s32.totalorder %s486_s21, %s554_s22  ;;  %p560_p7 = scmp.lt.s32.totalorder %s554_s22, %s554_s22 }
  0x18   :  { %vm43_vm0 = vcmp.gt.s32.totalorder %v42_v5, 0  ;;  %p561_p8 = por %p560_p7, %p559_p6 }
  0x19   :  { %v44_v7 = vsel %vm43_vm0, %v42_v5, 0 }
  0x1a   :  { %v46_v8 = vand.u32 31, %v44_v7  ;;  %v45_v10 = vshrl.u32 %v44_v7, 5  ;;  %p562_p9 = pnand %p561_p8, %p555_p5 }
  0x1c   :  { %v47_v11 = vsub.s32 32, %v46_v8  ;;  %v49_v13 = vshll.u32 %v581_v12, %v46_v8  ;;  %v52_v15 = vshll.u32 %v582_v14, %v46_v8  ;;  %v55_v17 = vshll.u32 %v583_v16, %v46_v8 }
  0x1d   :  { %v58_v19 = vshll.u32 %v584_v18, %v46_v8  ;;  %v61_v21 = vshll.u32 %v585_v20, %v46_v8  ;;  %vm64_vm1 = vcmp.lt.s32.totalorder %v45_v10, 1  ;;  %vm67_vm2 = vcmp.lt.s32.totalorder %v45_v10, 4 }
  0x1e   :  { %v48_v22 = vshrl.u32 %v581_v12, %v47_v11  ;;  %v50_v23 = vshrl.u32 %v582_v14, %v47_v11  ;;  %v53_v24 = vshrl.u32 %v583_v16, %v47_v11  ;;  %v56_v25 = vshrl.u32 %v584_v18, %v47_v11 }
  0x1f   :  { %v59_v26 = vshrl.u32 %v585_v20, %v47_v11  ;;  %v62_v28 = vshrl.u32 %v586_v27, %v47_v11  ;;  %vm65_vm3 = vcmp.lt.s32.totalorder %v45_v10, 2  ;;  %vm66_vm4 = vcmp.lt.s32.totalorder %v45_v10, 3 }
  0x20   :  { %v51_v30 = vor.u32 %v50_v23, %v49_v13  ;;  %v54_v31 = vor.u32 %v53_v24, %v52_v15  ;;  %v57_v32 = vor.u32 %v56_v25, %v55_v17 }
  0x21   :  { %v60_v33 = vor.u32 %v59_v26, %v58_v19  ;;  %v63_v34 = vor.u32 %v62_v28, %v61_v21 }
  0x22   :  { %v68_v35 = vsel %vm64_vm1, %v48_v22, %v51_v30  ;;  %v69_v36 = vsel %vm67_vm2, %v57_v32, 2102212464  ;;  %v72_v37 = vsel %vm64_vm1, %v51_v30, %v54_v31  ;;  %v76_v38 = vsel %vm64_vm1, %v54_v31, %v57_v32 }
  0x23   :  { %v70_v39 = vsel %vm66_vm4, %v54_v31, %v69_v36  ;;  %v73_v40 = vsel %vm67_vm2, %v60_v33, 920167782  ;;  %v77_v41 = vsel %vm67_vm2, %v63_v34, 1326507024  ;;  %vm460_vm1 = vcmp.eq.f32.partialorder %v609_v0, 0.0 }
  0x24   :  { %v74_v42 = vsel %vm66_vm4, %v57_v32, %v73_v40  ;;  %v78_v43 = vsel %vm66_vm4, %v60_v33, %v77_v41  ;;  %v71_v44 = vsel %vm65_vm3, %v68_v35, %v70_v39  ;;  %v644_v40 = vld [vmem:[%s715_s1] ss:$2 sm:$0x3]  ;;  %v246_v41 = vstv %s496_s0  ;;  %s494_s1 = sld [smem:[#allocation2 + $0x1]] }
  0x25   :  { %v75_v45 = vsel %vm65_vm3, %v72_v37, %v74_v42  ;;  %v79_v46 = vsel %vm65_vm3, %v76_v38, %v78_v43  ;;  %v87_v51 = vmul.u32 %v80_v29, %v71_v44  ;;  %v241_v42 = vstv %s25_s16 }
  0x26   :  { %v626_v47 = vmul.u32.u64.low %v80_v29, %v79_v46  ;;  %v627_v48 = vmul.u32.u64.high %v80_v29, %v79_v46, %v626_v47  ;;  %v629_v49 = vmul.u32.u64.low %v80_v29, %v75_v45  ;;  %v630_v50 = vmul.u32.u64.high %v80_v29, %v75_v45, %v629_v49 }
  0x27   :  { %v247_v43 = vmul.f32 %v246_v41, %v644_v40  ;;  %v470_v46 = vlaneseq }
  0x28   :  { %vm89_vm5 = vc.u32 %v627_v48, %v629_v49  ;;  %v90_v52 = vadd.s32 1, %v630_v50  ;;  %v88_v63 = vadd.s32 %v629_v49, %v627_v48 }
  0x29   :  { %vm651_vm0 = vcmp.lt.s32.totalorder %v470_v46, 256 }
  0x2a   :  { %v91_v53 = vsel %vm89_vm5, %v90_v52, %v630_v50 }
  0x2b   :  { %v92_v54 = vadd.s32 %v91_v53, %v87_v51 }
  0x2d   :  { %v93_v55 = vadd.s32 536870912, %v92_v54 }
  0x2f   :  { %v94_v56 = vshrl.u32 %v93_v55, 30 }
  0x31   :  { %v95_v57 = vshll.u32 %v94_v56, 30  ;;  %v118_v17 = vsub.s32 4, %v94_v56 }
  0x33   :  { %v96_v58 = vsub.s32 %v92_v54, %v95_v57  ;;  %v119_v22 = vsel %vm34_vm7, %v118_v17, %v94_v56 }
  0x34   :  { %v121_v24 = vsel %vm33_vm8, 0, %v119_v22 }
  0x35   :  { %v98_v59 = vsub.s32 0, %v96_v58  ;;  %v125_v25 = vadd.s32 3, %v121_v24  ;;  %v229_v28 = vand.u32 3, %v121_v24 }
  0x37   :  { %v499_v60 = vmin.u32 %v98_v59, %v96_v58  ;;  %v126_v26 = vand.u32 3, %v125_v25  ;;  %vm234_vm10 = vcmp.eq.s32.totalorder %v229_v28, 2  ;;  %vm231_vm12 = vcmp.eq.s32.totalorder %v229_v28, 0 }
  0x38   :  { %vm230_vm14 = vcmp.lt.s32.totalorder %v229_v28, 2 }
  0x39   :  { %v100_v61 = vclz %v499_v60  ;;  %vm131_vm9 = vcmp.eq.s32.totalorder %v126_v26, 2  ;;  %vm128_vm11 = vcmp.eq.s32.totalorder %v126_v26, 0  ;;  %vm127_vm13 = vcmp.lt.s32.totalorder %v126_v26, 2 }
  0x3b   :  { %v500_v62 = vadd.s32 4294967294, %v100_v61 }
  0x3d   :  { %vm501_vm6 = vcmp.lt.s32.totalorder %v500_v62, 0 }
  0x3e   :  { %v103_v1 = vsel %vm501_vm6, 0, %v500_v62 }
  0x3f   :  { %v104_v2 = vsub.s32 32, %v103_v1  ;;  %v105_v4 = vshll.u32 %v96_v58, %v103_v1  ;;  %v108_v5 = vsub.s32 4294967266, %v103_v1 }
  0x41   :  { %v106_v6 = vshrl.u32 %v88_v63, %v104_v2  ;;  %v109_v7 = vadd.s32 127, %v108_v5 }
  0x43   :  { %v107_v8 = vor.u32 %v106_v6, %v105_v4  ;;  %v110_v9 = vshll.u32 %v109_v7, 23 }
  0x45   :  { %v111_v10 = vor.u32 4788187, %v110_v9  ;;  %v114_v11 = vcvt.s32.f32 %v107_v8 }
  0x47   :  { %v112_v13 = vand.u32 2147483647, %v111_v10 }
  0x49   :  { %v115_v15 = vmul.f32 %v114_v11, %v112_v13 }
  0x4b   :  { %v116_v19 = vxor.u32 2147483648, %v115_v15 }
  0x4d   :  { %v117_v21 = vsel %vm34_vm7, %v116_v19, %v115_v15 }
  0x4e   :  { %v120_v23 = vsel %vm33_vm8, %v609_v0, %v117_v21 }
  0x4f   :  { %530 = vcosq.f32 %v120_v23 }
  0x50   :  { %532 = vsinq.f32 %v120_v23 }
  0x59   :  { %v531_v29 = vpop.eup %530 }
  0x5a   :  { %v533_v30 = vpop.eup %532  ;;  %v132_v31 = vxor.u32 2147483648, %v531_v29 }
  0x5b   :  { %v129_v3 = vxor.u32 2147483648, %v533_v30 }
  0x5c   :  { %v133_v32 = vsel %vm131_vm9, %v132_v31, %v533_v30  ;;  %v236_v33 = vsel %vm234_vm10, %v132_v31, %v533_v30 }
  0x5d   :  { %v130_v34 = vsel %vm128_vm11, %v531_v29, %v129_v3  ;;  %v233_v35 = vsel %vm231_vm12, %v531_v29, %v129_v3 }
  0x5e   :  { %v134_v36 = vsel %vm127_vm13, %v130_v34, %v133_v32  ;;  %v237_v37 = vsel %vm230_vm14, %v233_v35, %v236_v33 }
  0x5f   :  { %v135_v38 = vsel %vm124_vm15, nan, %v134_v36  ;;  %v238_v39 = vsel %vm124_vm15, nan, %v237_v37 }
  0x60   :  { %534 = vrcp.f32 %v135_v38  ;;  %v242_v44 = vmul.f32 %v241_v42, %v238_v39  ;;  %v248_v45 = vmul.f32 %v247_v43, %v135_v38 }
  0x61   :  { %536 = vrcp.f32 %v238_v39 }
  0x6a   :  { %v535_v47 = vpop.eup %534 }
  0x6b   :  { %v537_v48 = vpop.eup %536  ;;  %v647_v49 = vmul.f32 %v535_v47, %v242_v44 }
  0x6c   :  { %v649_v50 = vmul.f32 %v537_v48, %v248_v45 }
  0x6e   :  { %v253_v52 = vand.u32 2139095040, %v649_v50  ;;  %v461_v53 = vsel %vm460_vm1, 0.0, %v649_v50  ;;  %v250_v55 = vand.u32 2147483647, %v649_v50  ;;  %vm252_vm9 = vcmp.lt.s32.totalorder %v649_v50, 0 }
  0x6f   :  { %478 = vst.msk [vmem:[#allocation5 + $0x2] ss:$4 sm:$0x3] %vm651_vm0, %v461_v53 }
  0x70   :  { %v254_v54 = vshrl.u32 %v253_v52, 23  ;;  %v257_v58 = vand.u32 8388607, %v250_v55  ;;  %vm251_vm10 = vcmp.le.f32.partialorder %v250_v55, 0.7853982  ;;  %v244_v55 = vstv %s494_s1 }
  0x72   :  { %v506_v56 = vadd.s32 4294967169, %v254_v54  ;;  %v258_v61 = vor.u32 8388608, %v257_v58 }
  0x74   :  { %v260_v57 = vadd.s32 1, %v506_v56  ;;  %v298_v15 = vshll.u32 %v258_v61, 8 }
  0x76   :  { %vm261_vm2 = vcmp.gt.s32.totalorder %v260_v57, 0 }
  0x77   :  { %v262_v59 = vsel %vm261_vm2, %v260_v57, 0 }
  0x78   :  { %v264_v60 = vand.u32 31, %v262_v59  ;;  %v263_v62 = vshrl.u32 %v262_v59, 5 }
  0x7a   :  { %v265_v63 = vsub.s32 32, %v264_v60  ;;  %v267_v1 = vshll.u32 %v581_v12, %v264_v60  ;;  %v270_v2 = vshll.u32 %v582_v14, %v264_v60  ;;  %v273_v4 = vshll.u32 %v583_v16, %v264_v60 }
  0x7b   :  { %v276_v5 = vshll.u32 %v584_v18, %v264_v60  ;;  %v279_v6 = vshll.u32 %v585_v20, %v264_v60  ;;  %vm282_vm3 = vcmp.lt.s32.totalorder %v263_v62, 1  ;;  %vm285_vm4 = vcmp.lt.s32.totalorder %v263_v62, 4 }
  0x7c   :  { %v266_v7 = vshrl.u32 %v581_v12, %v265_v63  ;;  %v268_v8 = vshrl.u32 %v582_v14, %v265_v63  ;;  %v271_v9 = vshrl.u32 %v583_v16, %v265_v63  ;;  %v274_v10 = vshrl.u32 %v584_v18, %v265_v63 }
  0x7d   :  { %v277_v11 = vshrl.u32 %v585_v20, %v265_v63  ;;  %v280_v13 = vshrl.u32 %v586_v27, %v265_v63  ;;  %vm283_vm5 = vcmp.lt.s32.totalorder %v263_v62, 2  ;;  %vm284_vm6 = vcmp.lt.s32.totalorder %v263_v62, 3 }
  0x7e   :  { %v269_v17 = vor.u32 %v268_v8, %v267_v1  ;;  %v272_v19 = vor.u32 %v271_v9, %v270_v2  ;;  %v275_v21 = vor.u32 %v274_v10, %v273_v4 }
  0x7f   :  { %v278_v22 = vor.u32 %v277_v11, %v276_v5  ;;  %v281_v23 = vor.u32 %v280_v13, %v279_v6 }
  0x80   :  { %v286_v12 = vsel %vm282_vm3, %v266_v7, %v269_v17  ;;  %v287_v14 = vsel %vm285_vm4, %v275_v21, 2102212464  ;;  %v290_v24 = vsel %vm282_vm3, %v269_v17, %v272_v19  ;;  %v294_v16 = vsel %vm282_vm3, %v272_v19, %v275_v21 }
  0x81   :  { %v288_v25 = vsel %vm284_vm6, %v272_v19, %v287_v14  ;;  %v291_v18 = vsel %vm285_vm4, %v278_v22, 920167782  ;;  %v295_v26 = vsel %vm285_vm4, %v281_v23, 1326507024  ;;  %vm342_vm3 = vweird.f32 %v649_v50 }
  0x82   :  { %v292_v20 = vsel %vm284_vm6, %v275_v21, %v291_v18  ;;  %v296_v28 = vsel %vm284_vm6, %v278_v22, %v295_v26  ;;  %v289_v27 = vsel %vm283_vm5, %v286_v12, %v288_v25  ;;  %v464_v12 = vstv %s495_s19 }
  0x83   :  { %v293_v29 = vsel %vm283_vm5, %v290_v24, %v292_v20  ;;  %v297_v30 = vsel %vm283_vm5, %v294_v16, %v296_v28  ;;  %v305_v34 = vmul.u32 %v298_v15, %v289_v27  ;;  %v245_v14 = vmul.f32 %v244_v55, %v644_v40 }
  0x84   :  { %v676_v31 = vmul.u32.u64.low %v298_v15, %v297_v30  ;;  %v677_v3 = vmul.u32.u64.high %v298_v15, %v297_v30, %v676_v31  ;;  %v679_v32 = vmul.u32.u64.low %v298_v15, %v293_v29  ;;  %v680_v33 = vmul.u32.u64.high %v298_v15, %v293_v29, %v679_v32 }
  0x86   :  { %vm307_vm7 = vc.u32 %v677_v3, %v679_v32  ;;  %v308_v35 = vadd.s32 1, %v680_v33  ;;  %v306_v47 = vadd.s32 %v679_v32, %v677_v3 }
  0x88   :  { %v309_v36 = vsel %vm307_vm7, %v308_v35, %v680_v33 }
  0x89   :  { %v310_v37 = vadd.s32 %v309_v36, %v305_v34 }
  0x8b   :  { %v311_v38 = vadd.s32 536870912, %v310_v37 }
  0x8d   :  { %v312_v39 = vshrl.u32 %v311_v38, 30 }
  0x8f   :  { %v313_v41 = vshll.u32 %v312_v39, 30  ;;  %v336_v63 = vsub.s32 4, %v312_v39 }
  0x91   :  { %v314_v42 = vsub.s32 %v310_v37, %v313_v41  ;;  %v337_v4 = vsel %vm252_vm9, %v336_v63, %v312_v39 }
  0x92   :  { %v339_v7 = vsel %vm251_vm10, 0, %v337_v4 }
  0x93   :  { %v316_v43 = vsub.s32 0, %v314_v42  ;;  %v343_v8 = vadd.s32 3, %v339_v7  ;;  %v447_v10 = vand.u32 3, %v339_v7 }
  0x95   :  { %v507_v44 = vmin.u32 %v316_v43, %v314_v42  ;;  %v344_v9 = vand.u32 3, %v343_v8  ;;  %vm452_vm12 = vcmp.eq.s32.totalorder %v447_v10, 2  ;;  %vm449_vm14 = vcmp.eq.s32.totalorder %v447_v10, 0 }
  0x96   :  { %vm448_vm2 = vcmp.lt.s32.totalorder %v447_v10, 2 }
  0x97   :  { %v318_v45 = vclz %v507_v44  ;;  %vm349_vm11 = vcmp.eq.s32.totalorder %v344_v9, 2  ;;  %vm346_vm13 = vcmp.eq.s32.totalorder %v344_v9, 0  ;;  %vm345_vm15 = vcmp.lt.s32.totalorder %v344_v9, 2 }
  0x99   :  { %v508_v46 = vadd.s32 4294967294, %v318_v45 }
  0x9b   :  { %vm509_vm8 = vcmp.lt.s32.totalorder %v508_v46, 0 }
  0x9c   :  { %v321_v48 = vsel %vm509_vm8, 0, %v508_v46 }
  0x9d   :  { %v322_v52 = vsub.s32 32, %v321_v48  ;;  %v323_v53 = vshll.u32 %v314_v42, %v321_v48  ;;  %v326_v54 = vsub.s32 4294967266, %v321_v48 }
  0x9f   :  { %v324_v56 = vshrl.u32 %v306_v47, %v322_v52  ;;  %v327_v57 = vadd.s32 127, %v326_v54 }
  0xa1   :  { %v325_v58 = vor.u32 %v324_v56, %v323_v53  ;;  %v328_v59 = vshll.u32 %v327_v57, 23 }
  0xa3   :  { %v329_v60 = vor.u32 4788187, %v328_v59  ;;  %v332_v61 = vcvt.s32.f32 %v325_v58 }
  0xa5   :  { %v330_v62 = vand.u32 2147483647, %v329_v60 }
  0xa7   :  { %v333_v1 = vmul.f32 %v332_v61, %v330_v62 }
  0xa9   :  { %v334_v2 = vxor.u32 2147483648, %v333_v1 }
  0xab   :  { %v335_v5 = vsel %vm252_vm9, %v334_v2, %v333_v1 }
  0xac   :  { %v338_v6 = vsel %vm251_vm10, %v649_v50, %v335_v5 }
  0xad   :  { %538 = vcosq.f32 %v338_v6 }
  0xae   :  { %540 = vsinq.f32 %v338_v6 }
  0xb7   :  { %v539_v11 = vpop.eup %538 }
  0xb8   :  { %v541_v13 = vpop.eup %540  ;;  %v350_v15 = vxor.u32 2147483648, %v539_v11 }
  0xb9   :  { %v347_v17 = vxor.u32 2147483648, %v541_v13 }
  0xba   :  { %v351_v19 = vsel %vm349_vm11, %v350_v15, %v541_v13  ;;  %v454_v21 = vsel %vm452_vm12, %v350_v15, %v541_v13 }
  0xbb   :  { %v348_v22 = vsel %vm346_vm13, %v539_v11, %v347_v17  ;;  %v451_v23 = vsel %vm449_vm14, %v539_v11, %v347_v17 }
  0xbc   :  { %v352_v24 = vsel %vm345_vm15, %v348_v22, %v351_v19  ;;  %v455_v16 = vsel %vm448_vm2, %v451_v23, %v454_v21 }
  0xbd   :  { %v353_v25 = vsel %vm342_vm3, nan, %v352_v24  ;;  %v456_v18 = vsel %vm342_vm3, nan, %v455_v16 }
  0xbe   :  { %v457_v26 = vmul.f32 %v353_v25, %v647_v49  ;;  %v458_v20 = vsub.f32 1.0, %v456_v18  ;;  %v465_v28 = vmul.f32 %v464_v12, %v456_v18  ;;  %v468_v27 = vmul.f32 %v464_v12, %v353_v25 }
  0xc0   :  { %v459_v29 = vmul.f32 %v458_v20, %v647_v49  ;;  %v462_v50 = vsel %vm460_vm1, %v245_v14, %v457_v26 }
  0xc1   :  { %v466_v30 = vadd.f32 %v465_v28, %v462_v50 }
  0xc2   :  { %v463_v40 = vsel %vm460_vm1, 0.0, %v459_v29 }
  0xc3   :  { %v467_v31 = vsub.f32 %v466_v30, %v464_v12  ;;  %v469_v3 = vadd.f32 %v468_v27, %v463_v40 }
  0xc5   :  { %474 = vst.msk [vmem:[#allocation5] ss:$4 sm:$0x3] %vm651_vm0, %v467_v31  ;;  %476 = vst.msk [vmem:[#allocation5 + $0x1] ss:$4 sm:$0x3] %vm651_vm0, %v469_v3 }
  0xc6   :  { %565 = shalt.err (!%p562_p9)
}
  0xc7   :  { %s566_s25 = scalar_lea.hbm %s716_s2, 128 }
  0xc8   :  { %p567_p10 = scmp.ne.s32.totalorder %s716_s2, %s566_s25  ;;  %p570_p11 = scmp.lt.u32.totalorder %s566_s25, %s716_s2 }
  0xca   :  { %p572_p12 = pnand %p570_p11, %p567_p10 }
  0xcc   :  { %575 = shalt.err (!%p572_p12)
}
  0xcd   :  { %488 = dma.vmem_to_hbm [thread:$0]  %s486_s21, 128, %s716_s2, [#allocation3]  }
  0xce   :  { %578 = dma.done.wait [#allocation3], 128  }
  0xcf   :  { %579 = vsyncadd [#allocation3], 4294967168 }
  0xd0   :  { %492 = vsyncpa [#allocation3], 1 }
  0xd1   :  { %493 = vsyncpa [#allocation4], 1 }

</bundles_post_ra>
